<compile_context>
chip_gen: v7x
topology: tpu7x:2x2x1
jax: 0.10.0
libtpu: 0.0.40
codegen_flags: <defaults>
</compile_context>

<pallas_src>
import jax
import jax.numpy as jnp
from jax import lax
from jax.experimental import pallas as pl
from jax.experimental.pallas import tpu as pltpu

EPS = 1e-5  # nn.LayerNorm default


def _round_up(n, m):
    return ((n + m - 1) // m) * m


def _vmem_capacity_bytes():
    """Physical VMEM of the local TPU generation (64 MiB fallback = v7x)."""
    try:
        cap = int(pltpu.get_tpu_info().vmem_capacity_bytes)
        if cap > 0:
            return cap
    except Exception:
        pass
    return 64 << 20


def prenorm_residual_kernel(x_ref, wt_ref, b_ref, o_ref):
    """x_ref/o_ref: (Bt, C, ts) NCHW tile (channels=sublanes, spatial=lanes).
    wt_ref: (C_out, C_in) folded weight W'^T.  b_ref: (C_out, 1) folded bias."""
    w = wt_ref[...]
    b = b_ref[...]
    for bi in range(x_ref.shape[0]):          # Bt is a small compile-time constant
        xf = x_ref[bi].astype(jnp.float32)    # (C, ts)
        # LayerNorm stats over the channel (sublane) axis; biased var like PyTorch.
        mu = jnp.mean(xf, axis=0, keepdims=True)
        d = xf - mu
        var = jnp.mean(d * d, axis=0, keepdims=True)
        inv = lax.rsqrt(var + EPS)            # (1, ts)
        # 1x1 channel mix on the MXU.  gamma/beta are folded into W'/b'; the
        # per-lane rsqrt scale is constant along the contraction, so it is
        # applied after the matmul (removes one (C, ts) f32 temporary).
        y = jnp.dot(w, d.astype(w.dtype), preferred_element_type=jnp.float32)
        # Residual uses a fresh load of the raw tile (shortens xf's live range).
        res = x_ref[bi].astype(jnp.float32)
        o_ref[bi] = (y * inv + b + res).astype(o_ref.dtype)


def _pick_spatial_tile(S, ts_cap):
    """Lane-dense spatial tile and the padded spatial extent it divides."""
    S128 = _round_up(S, 128)
    cap = max(128, (min(ts_cap, S128) // 128) * 128)
    # Option A: largest multiple of 128 <= cap dividing the 128-padded extent
    # (spatial padding <= 127 lanes).
    ts_a = 128
    for t in range(cap, 127, -128):
        if S128 % t == 0:
            ts_a = t
            break
    # Option B: the full cap, padding the spatial axis up to a multiple of it.
    ts_b = cap
    pad_b = _round_up(S, ts_b) - S
    ts = ts_a if (ts_a >= cap // 2 or pad_b > max(S // 8, 128)) else ts_b
    return ts, _round_up(S, ts)


def _pick_batch_block(B, per_image_bytes, s_steps):
    """Block several images per grid step when per-step work is tiny, but never
    collapse a multi-step grid to a single step (v7x has 2 TCs to feed)."""
    target = 1 << 20
    Bt = 1
    for cand in range(2, B + 1):
        if B % cand:
            continue
        if cand * per_image_bytes > target:
            break
        if (B // cand) * s_steps < 2 and B * s_steps >= 2:
            break
        Bt = cand
    return Bt


def prenorm_residual(x_nchw, gamma, beta, w, b, *, spatial_tile=None,
                     mxu_dtype=None):
    """out = fn(LayerNorm_channels(x)) + x in NCHW, fn = 1x1 channel mix.

    x_nchw: (B, C, H, W); gamma/beta: (C,); w: (C_in, C_out); b: (C_out,).
    mxu_dtype: optionally cast the folded weight (and hence the MXU operands),
      e.g. jnp.bfloat16 — recommended on v5e for large C where an f32 matmul
      takes the slow multi-pass MXU path.  Default keeps native precision.
    """
    B, C, H, W = x_nchw.shape
    C_in, C_out = w.shape
    assert C_in == C, "fn weight must consume the normalized channel dim"
    assert C_out == C_in, "PreNormResidual requires fn to preserve channels"
    S = H * W
    x3 = x_nchw.reshape(B, C, S)                     # free reshape; stays NCHW

    # Fold LayerNorm affine into the 1x1 channel mix:
    #   (z*gamma + beta) @ W + b == z @ (gamma[:,None]*W) + (beta @ W + b)
    w_dtype = jnp.dtype(mxu_dtype) if mxu_dtype is not None else w.dtype
    wt = jnp.transpose(gamma[:, None].astype(w.dtype) * w).astype(w_dtype)  # (C_out, C_in)
    b_col = (beta.astype(jnp.float32) @ w.astype(jnp.float32)
             + b.astype(jnp.float32)).reshape(C_out, 1)                     # f32

    x_elt = jnp.dtype(x_nchw.dtype).itemsize
    w_elt = jnp.dtype(w_dtype).itemsize
    cap_bytes = _vmem_capacity_bytes()               # generation-aware (v7x: 64 MiB)

    # Spatial tile: as large as the VMEM budget / bandwidth target allow.
    if spatial_tile is None:
        budget = int(0.55 * cap_bytes) - 2 * C_out * C_in * w_elt - (1 << 20)
        per_lane = C * 4 * x_elt + C * 16            # in+out double-buffered + f32 temps
        ts_vmem = max(128, budget // max(per_lane, 1))
        ts_bw = max(512, (6 << 20) // max(C * x_elt, 1))   # ~6 MiB per x/out buffer
        ts, S_pad = _pick_spatial_tile(S, min(ts_vmem, ts_bw, 8192))
    else:
        ts = spatial_tile
        assert ts % 128 == 0, "spatial_tile must be a multiple of 128"
        S_pad = _round_up(S, ts)

    # Keep >= 2 grid steps so v7x's two TensorCores both get work.
    if B == 1 and S_pad == ts and S_pad >= 256:
        for t in range((S_pad // 2 // 128) * 128, 127, -128):
            if S_pad % t == 0:
                ts = t
                break

    s_steps = S_pad // ts
    Bt = _pick_batch_block(B, C * ts * x_elt, s_steps)

    # Pad the spatial axis so every tile is lane-dense (unmasked vst).
    # TODO(synk): mask the last tile in-kernel instead of this extra HBM pad pass
    # for very large non-128-aligned images.
    x3p = x3 if S_pad == S else jnp.pad(x3, ((0, 0), (0, 0), (0, S_pad - S)))

    # VMEM estimate -> scoped-VMEM limit (headroom under the physical cap).
    tile_bytes = Bt * C * ts * x_elt
    need = 4 * tile_bytes                                # in + out, double-buffered
    need += 2 * C_out * C_in * w_elt + 2 * C_out * 4     # params (worst-case 2x)
    need += 4 * C * ts * 4                               # f32 temporaries
    vmem_limit = None
    if need > (12 << 20):
        vmem_limit = int(min(max(int(need * 1.4), 32 << 20), int(0.85 * cap_bytes)))

    def _build(single_buffer_params):
        # Grid-invariant weight/bias: single-buffered to free VMEM for the tile.
        pmode = dict(pipeline_mode=pl.Buffered(1)) if single_buffer_params else {}
        return pl.pallas_call(
            prenorm_residual_kernel,
            out_shape=jax.ShapeDtypeStruct((B, C, S_pad), x_nchw.dtype),
            grid_spec=pltpu.PrefetchScalarGridSpec(
                num_scalar_prefetch=0,
                grid=(B // Bt, s_steps),
                in_specs=[
                    pl.BlockSpec((Bt, C, ts), lambda bi, si: (bi, 0, si)),
                    pl.BlockSpec((C_out, C_in), lambda bi, si: (0, 0), **pmode),
                    pl.BlockSpec((C_out, 1), lambda bi, si: (0, 0), **pmode),
                ],
                out_specs=pl.BlockSpec((Bt, C, ts), lambda bi, si: (bi, 0, si)),
            ),
            compiler_params=pltpu.CompilerParams(
                dimension_semantics=("parallel", "parallel"),
                vmem_limit_bytes=vmem_limit,
            ),
        )

    try:
        out3 = _build(True)(x3p, wt, b_col)
    except Exception:
        # Fallback for jax versions without BlockSpec.pipeline_mode support.
        out3 = _build(False)(x3p, wt, b_col)

    if S_pad != S:
        out3 = out3[:, :, :S]
    return out3.reshape(B, C, H, W)


def reference(x_nchw, gamma, beta, w, b):
    x = jnp.transpose(x_nchw, (0, 2, 3, 1)).astype(jnp.float32)
    mu = jnp.mean(x, axis=-1, keepdims=True)
    var = jnp.mean((x - mu) ** 2, axis=-1, keepdims=True)
    xn = (x - mu) / jnp.sqrt(var + EPS) * gamma + beta
    y = xn @ w.astype(jnp.float32) + b
    out = y + x
    return jnp.transpose(out, (0, 3, 1, 2)).astype(x_nchw.dtype)


if __name__ == "__main__":
    B, C, H, W = 2, 4, 16, 16
    key = jax.random.PRNGKey(0)
    kx, kw, kb, kg, kbe = jax.random.split(key, 5)

    x = jax.random.normal(kx, (B, C, H, W), dtype=jnp.float32)

    # Deterministic parameter init (non-trivial gamma/beta to exercise folding).
    gamma = 1.0 + 0.1 * jax.random.normal(kg, (C,), dtype=jnp.float32)
    beta = 0.05 * jax.random.normal(kbe, (C,), dtype=jnp.float32)
    w = jax.random.normal(kw, (C, C), dtype=jnp.float32) * 0.1
    b = jax.random.normal(kb, (C,), dtype=jnp.float32) * 0.01

    out = prenorm_residual(x, gamma, beta, w, b)
    out = jax.block_until_ready(out)

    ref = reference(x, gamma, beta, w, b)
    assert out.shape == (B, C, H, W)
    assert jnp.allclose(out, ref, atol=1e-4, rtol=1e-4), \
        f"max err {jnp.max(jnp.abs(out - ref))}"

    print("KERNEL_OK")
</pallas_src>

<mosaic_0001>
module attributes {stable_mosaic.version = 11 : i64} {
  func.func @prenorm_residual_kernel(%arg0: i32, %arg1: i32, %arg2: memref<1x4x256xf32, #tpu.memory_space<vmem>>, %arg3: memref<4x4xf32, #tpu.memory_space<vmem>>, %arg4: memref<4x1xf32, #tpu.memory_space<vmem>>, %arg5: memref<1x4x256xf32, #tpu.memory_space<vmem>>) attributes {dimension_semantics = [#tpu.dimension_semantics<parallel>, #tpu.dimension_semantics<parallel>], iteration_bounds = array<i64: 2, 1>, scalar_prefetch = 0 : i64, scratch_operands = 0 : i64, tpu.core_type = #tpu.core_type<tc>, window_params = [{transform_indices = @transform_0, window_bounds = array<i64: 1, 4, 256>}, {pipeline_mode = #tpu.pipeline_mode<synchronous>, transform_indices = @transform_1, window_bounds = array<i64: 4, 4>}, {pipeline_mode = #tpu.pipeline_mode<synchronous>, transform_indices = @transform_2, window_bounds = array<i64: 4, 1>}, {transform_indices = @transform_3, window_bounds = array<i64: 1, 4, 256>}]} {
    %c0 = arith.constant 0 : index
    %c0_0 = arith.constant 0 : index
    %0 = vector.load %arg3[%c0, %c0_0] : memref<4x4xf32, #tpu.memory_space<vmem>>, vector<4x4xf32>
    %c0_1 = arith.constant 0 : index
    %c0_2 = arith.constant 0 : index
    %1 = vector.load %arg4[%c0_1, %c0_2] : memref<4x1xf32, #tpu.memory_space<vmem>>, vector<4x1xf32>
    %c0_3 = arith.constant 0 : index
    %c0_4 = arith.constant 0 : index
    %c0_5 = arith.constant 0 : index
    %2 = vector.load %arg2[%c0_3, %c0_4, %c0_5] : memref<1x4x256xf32, #tpu.memory_space<vmem>>, vector<1x4x256xf32>
    %3 = vector.shape_cast %2 : vector<1x4x256xf32> to vector<4x256xf32>
    %cst = arith.constant dense<0.000000e+00> : vector<256xf32>
    %4 = vector.multi_reduction <add>, %3, %cst [0] : vector<4x256xf32> to vector<256xf32>
    %5 = vector.shape_cast %4 : vector<256xf32> to vector<1x256xf32>
    %cst_6 = arith.constant 4.000000e+00 : f32
    %6 = vector.broadcast %cst_6 : f32 to vector<1x256xf32>
    %7 = arith.divf %5, %6 : vector<1x256xf32>
    %8 = vector.broadcast %7 : vector<1x256xf32> to vector<4x256xf32>
    %9 = arith.subf %3, %8 : vector<4x256xf32>
    %10 = arith.mulf %9, %9 : vector<4x256xf32>
    %cst_7 = arith.constant dense<0.000000e+00> : vector<256xf32>
    %11 = vector.multi_reduction <add>, %10, %cst_7 [0] : vector<4x256xf32> to vector<256xf32>
    %12 = vector.shape_cast %11 : vector<256xf32> to vector<1x256xf32>
    %cst_8 = arith.constant 4.000000e+00 : f32
    %13 = vector.broadcast %cst_8 : f32 to vector<1x256xf32>
    %14 = arith.divf %12, %13 : vector<1x256xf32>
    %cst_9 = arith.constant 9.99999974E-6 : f32
    %15 = vector.broadcast %cst_9 : f32 to vector<1x256xf32>
    %16 = arith.addf %14, %15 : vector<1x256xf32>
    %17 = math.rsqrt %16 : vector<1x256xf32>
    %cst_10 = arith.constant dense<0.000000e+00> : vector<4x256xf32>
    %18 = tpu.matmul %0, %9, %cst_10 {dimension_numbers = #tpu.dot_dimension_numbers<[1], [0], [0], [1], [0, 0, 1, 1], [], []>} : vector<4x4xf32>, vector<4x256xf32>, vector<4x256xf32> -> vector<4x256xf32>
    %c0_11 = arith.constant 0 : index
    %c0_12 = arith.constant 0 : index
    %c0_13 = arith.constant 0 : index
    %19 = vector.load %arg2[%c0_11, %c0_12, %c0_13] : memref<1x4x256xf32, #tpu.memory_space<vmem>>, vector<1x4x256xf32>
    %20 = vector.shape_cast %19 : vector<1x4x256xf32> to vector<4x256xf32>
    %21 = vector.broadcast %17 : vector<1x256xf32> to vector<4x256xf32>
    %22 = arith.mulf %18, %21 : vector<4x256xf32>
    %23 = vector.broadcast %1 : vector<4x1xf32> to vector<4x256xf32>
    %24 = arith.addf %22, %23 : vector<4x256xf32>
    %25 = arith.addf %24, %20 : vector<4x256xf32>
    %c0_14 = arith.constant 0 : index
    %c0_15 = arith.constant 0 : index
    %c0_16 = arith.constant 0 : index
    %26 = vector.load %arg5[%c0_14, %c0_15, %c0_16] : memref<1x4x256xf32, #tpu.memory_space<vmem>>, vector<1x4x256xf32>
    %27 = vector.shape_cast %26 : vector<1x4x256xf32> to vector<4x256xf32>
    %28 = vector.shape_cast %25 : vector<4x256xf32> to vector<1x4x256xf32>
    tpu.vector_store %arg5[%c0_14, %c0_15, %c0_16], %28 {strides = array<i32>} : memref<1x4x256xf32, #tpu.memory_space<vmem>>, vector<1x4x256xf32>,
    return
  }
  func.func @transform_0(%arg0: i32, %arg1: i32) -> (i32, i32, i32) {
    %c0_i32 = arith.constant 0 : i32
    %c0_i32_0 = arith.constant 0 : i32
    return %arg0, %c0_i32, %arg1 : i32, i32, i32
  }
  func.func @transform_1(%arg0: i32, %arg1: i32) -> (i32, i32) {
    %c0_i32 = arith.constant 0 : i32
    %c0_i32_0 = arith.constant 0 : i32
    %c0_i32_1 = arith.constant 0 : i32
    return %c0_i32, %c0_i32_0 : i32, i32
  }
  func.func @transform_2(%arg0: i32, %arg1: i32) -> (i32, i32) {
    %c0_i32 = arith.constant 0 : i32
    %c0_i32_0 = arith.constant 0 : i32
    %c0_i32_1 = arith.constant 0 : i32
    return %c0_i32, %c0_i32_0 : i32, i32
  }
  func.func @transform_3(%arg0: i32, %arg1: i32) -> (i32, i32, i32) {
    %c0_i32 = arith.constant 0 : i32
    %c0_i32_0 = arith.constant 0 : i32
    return %arg0, %c0_i32, %arg1 : i32, i32, i32
  }
}

module attributes {stable_mosaic.version = 11 : i64} {
  func.func @prenorm_residual_kernel(%arg0: i32, %arg1: i32, %arg2: memref<1x4x256xf32, #tpu.memory_space<vmem>>, %arg3: memref<4x4xf32, #tpu.memory_space<vmem>>, %arg4: memref<4x1xf32, #tpu.memory_space<vmem>>, %arg5: memref<1x4x256xf32, #tpu.memory_space<vmem>>) attributes {dimension_semantics = [#tpu.dimension_semantics<parallel>, #tpu.dimension_semantics<parallel>], iteration_bounds = array<i64: 2, 1>, scalar_prefetch = 0 : i64, scratch_operands = 0 : i64, tpu.core_type = #tpu.core_type<tc>, window_params = [{transform_indices = @transform_0, window_bounds = array<i64: 1, 4, 256>}, {pipeline_mode = #tpu.pipeline_mode<synchronous>, transform_indices = @transform_1, window_bounds = array<i64: 4, 4>}, {pipeline_mode = #tpu.pipeline_mode<synchronous>, transform_indices = @transform_2, window_bounds = array<i64: 4, 1>}, {transform_indices = @transform_3, window_bounds = array<i64: 1, 4, 256>}]} {
    %c0 = arith.constant 0 : index
    %c0_0 = arith.constant 0 : index
    %0 = vector.load %arg3[%c0, %c0_0] : memref<4x4xf32, #tpu.memory_space<vmem>>, vector<4x4xf32>
    %c0_1 = arith.constant 0 : index
    %c0_2 = arith.constant 0 : index
    %1 = vector.load %arg4[%c0_1, %c0_2] : memref<4x1xf32, #tpu.memory_space<vmem>>, vector<4x1xf32>
    %c0_3 = arith.constant 0 : index
    %c0_4 = arith.constant 0 : index
    %c0_5 = arith.constant 0 : index
    %2 = vector.load %arg2[%c0_3, %c0_4, %c0_5] : memref<1x4x256xf32, #tpu.memory_space<vmem>>, vector<1x4x256xf32>
    %3 = vector.shape_cast %2 : vector<1x4x256xf32> to vector<4x256xf32>
    %cst = arith.constant dense<0.000000e+00> : vector<256xf32>
    %4 = vector.multi_reduction <add>, %3, %cst [0] : vector<4x256xf32> to vector<256xf32>
    %5 = vector.shape_cast %4 : vector<256xf32> to vector<1x256xf32>
    %cst_6 = arith.constant 4.000000e+00 : f32
    %6 = vector.broadcast %cst_6 : f32 to vector<1x256xf32>
    %7 = arith.divf %5, %6 : vector<1x256xf32>
    %8 = vector.broadcast %7 : vector<1x256xf32> to vector<4x256xf32>
    %9 = arith.subf %3, %8 : vector<4x256xf32>
    %10 = arith.mulf %9, %9 : vector<4x256xf32>
    %cst_7 = arith.constant dense<0.000000e+00> : vector<256xf32>
    %11 = vector.multi_reduction <add>, %10, %cst_7 [0] : vector<4x256xf32> to vector<256xf32>
    %12 = vector.shape_cast %11 : vector<256xf32> to vector<1x256xf32>
    %cst_8 = arith.constant 4.000000e+00 : f32
    %13 = vector.broadcast %cst_8 : f32 to vector<1x256xf32>
    %14 = arith.divf %12, %13 : vector<1x256xf32>
    %cst_9 = arith.constant 9.99999974E-6 : f32
    %15 = vector.broadcast %cst_9 : f32 to vector<1x256xf32>
    %16 = arith.addf %14, %15 : vector<1x256xf32>
    %17 = math.rsqrt %16 : vector<1x256xf32>
    %cst_10 = arith.constant dense<0.000000e+00> : vector<4x256xf32>
    %18 = tpu.matmul %0, %9, %cst_10 {dimension_numbers = #tpu.dot_dimension_numbers<[1], [0], [0], [1], [0, 0, 1, 1], [], []>} : vector<4x4xf32>, vector<4x256xf32>, vector<4x256xf32> -> vector<4x256xf32>
    %c0_11 = arith.constant 0 : index
    %c0_12 = arith.constant 0 : index
    %c0_13 = arith.constant 0 : index
    %19 = vector.load %arg2[%c0_11, %c0_12, %c0_13] : memref<1x4x256xf32, #tpu.memory_space<vmem>>, vector<1x4x256xf32>
    %20 = vector.shape_cast %19 : vector<1x4x256xf32> to vector<4x256xf32>
    %21 = vector.broadcast %17 : vector<1x256xf32> to vector<4x256xf32>
    %22 = arith.mulf %18, %21 : vector<4x256xf32>
    %23 = vector.broadcast %1 : vector<4x1xf32> to vector<4x256xf32>
    %24 = arith.addf %22, %23 : vector<4x256xf32>
    %25 = arith.addf %24, %20 : vector<4x256xf32>
    %c0_14 = arith.constant 0 : index
    %c0_15 = arith.constant 0 : index
    %c0_16 = arith.constant 0 : index
    %26 = vector.load %arg5[%c0_14, %c0_15, %c0_16] : memref<1x4x256xf32, #tpu.memory_space<vmem>>, vector<1x4x256xf32>
    %27 = vector.shape_cast %26 : vector<1x4x256xf32> to vector<4x256xf32>
    %28 = vector.shape_cast %25 : vector<4x256xf32> to vector<1x4x256xf32>
    tpu.vector_store %arg5[%c0_14, %c0_15, %c0_16], %28 {strides = array<i32>} : memref<1x4x256xf32, #tpu.memory_space<vmem>>, vector<1x4x256xf32>,
    return
  }
  func.func @transform_0(%arg0: i32, %arg1: i32) -> (i32, i32, i32) {
    %c0_i32 = arith.constant 0 : i32
    %c0_i32_0 = arith.constant 0 : i32
    return %arg0, %c0_i32, %arg1 : i32, i32, i32
  }
  func.func @transform_1(%arg0: i32, %arg1: i32) -> (i32, i32) {
    %c0_i32 = arith.constant 0 : i32
    %c0_i32_0 = arith.constant 0 : i32
    %c0_i32_1 = arith.constant 0 : i32
    return %c0_i32, %c0_i32_0 : i32, i32
  }
  func.func @transform_2(%arg0: i32, %arg1: i32) -> (i32, i32) {
    %c0_i32 = arith.constant 0 : i32
    %c0_i32_0 = arith.constant 0 : i32
    %c0_i32_1 = arith.constant 0 : i32
    return %c0_i32, %c0_i32_0 : i32, i32
  }
  func.func @transform_3(%arg0: i32, %arg1: i32) -> (i32, i32, i32) {
    %c0_i32 = arith.constant 0 : i32
    %c0_i32_0 = arith.constant 0 : i32
    return %arg0, %c0_i32, %arg1 : i32, i32, i32
  }
}

</mosaic_0001>

<bundles_post_ra>
// kernel: tpu_custom_call.1
= control target key start
LH: loop header
LB: loop body
LE: loop exit
PB: predicated region body
PF: predicated region fallthrough
CT: control target
= control target key end

     0   :  { %8 = vsyncpa [#allocation3], 0  ;;  %s874_s0 = inlined_call_operand.hbm [shape: f32[2,4,256], index: 0, kind: input, shape index: {}]   ;;  %s875_s1 = inlined_call_operand.vmem [shape: f32[4,4], index: 1, kind: input, shape index: {}]   ;;  %s876_s2 = inlined_call_operand.vmem [shape: f32[4,1], index: 2, kind: input, shape index: {}]   ;;  %s877_s3 = inlined_call_operand.hbm [shape: f32[2,4,256], index: 3, kind: output, shape index: {}]  }
   0x1   :  { %10 = vsyncpa [#allocation3 + $0x1], 0 }
   0x2   :  { %11 = vsyncpa [#allocation4], 0 }
   0x3   :  { %13 = vsyncpa [#allocation4 + $0x1], 0  ;;  %s686_s12 = smov 0   ;;  %s688_s13 = smov 0  }
   0x4   :  { %s690_s14 = smov 0   ;;  %s692_s15 = smov 0  }
   0x5   :  { %s694_s16 = smov 0   ;;  %s696_s17 = smov 0  }
   0x6 LB: > { %s458_s18 = sadd.s32 4294967295, %s660_s17   ;;  %s459_s19 = sadd.s32 4294967294, %s660_s17   ;;  %s660_s17 = sphi %s696_s17, %s19_s17   ;;  %s656_s16 = sphi %s694_s16, %s893_s16   ;;  %s652_s15 = sphi %s692_s15, %s892_s15   ;;  %s648_s14 = sphi %s690_s14, %s891_s14   ;;  %s644_s13 = sphi %s688_s13, %s890_s13   ;;  %s640_s12 = sphi %s686_s12, %s889_s12  }
   0x7   : > { %s31_s20 = sadd.s32 1, %s656_s16  ;;  %s40_s21 = sadd.s32 1, %s648_s14 }
   0x8   : > { %p33_p0 = scmp.ge.s32.totalorder %s31_s20, 2  ;;  %p47_p1 = scmp.ne.s32.totalorder %s648_s14, %s644_s13 }
   0x9   : > { %p48_p2 = scmp.eq.s32.totalorder %s660_s17, 0  ;;  %p53_p3 = scmp.ne.s32.totalorder %s644_s13, %s640_s12 }
   0xa   : > { %s895_s20 = smov (%p33_p0, %s31_s20), 0  ;;  %p54_p5 = scmp.eq.s32.totalorder %s458_s18, 0 }
   0xb   : > { %p727_p4 = por %p48_p2, %p47_p1  ;;  %s35_s23 = ssub.s32 %s656_s16, %s895_s20 }
   0xc   : > { %p121_p6 = scmp.eq.s32.totalorder %s458_s18, 1  ;;  %p38_p7 = scmp.eq.s32.totalorder %s35_s23, 0 }
   0xd   : > { %p733_p8 = por %p54_p5, %p53_p3  ;;  %p127_p10 = scmp.eq.s32.totalorder %s459_s19, 1 }
   0xe   : > { %p737_p9 = por %p121_p6, %p47_p1  ;;  %p490_p13 = scmp.lt.s32.totalorder %s660_s17, 2 }
   0xf   : > { %s742_s26 = scalar_select %p38_p7, %s648_s14, %s40_s21  }
  0x10   : > { %s881_s25 = scalar_select %p737_p9, 1, 0 }
  0x11   : > { %p744_p11 = por %p127_p10, %p53_p3  ;;  %s153_s28 = sand.u32 1, %s648_s14  }
  0x12   : > { %s462_s29 = sshll.u32 %s153_s28, 3  ;;  %s476_s30 = sshll.u32 %s656_s16, 7 }
  0x13   : > { %s882_s27 = scalar_select %p744_p11, 1, 0 }
  0x14   : > { %s755_s6 = scalar_lea.hbm %s874_s0, %s476_s30  ;;  %s157_s7 = scalar_lea.vmem [#allocation2], %s462_s29 }
  0x15   : > { %s167_s8 = sshll.u32 %s157_s7, 4  ;;  %p761_p0 = pnand %p490_p13, %p727_p4  ;;  %s757_s8 = int_to_ptr.vmem [resolvable:$true] %s167_s8 }
  0x16   : > { %s154_s10 = scalar_lea.sflag [#allocation3], %s153_s28  ;;  %s548_s11 = scalar_lea.hbm %s755_s6, 128 }
  0x17   : > { %p549_p3 = scmp.ne.s32.totalorder %s755_s6, %s548_s11  ;;  %p550_p5 = pneg %p761_p0 }
  0x18   : > { %s553_s21 = scalar_lea.hbm %s874_s0, 256  ;;  %p554_p4 = scmp.lt.u32.totalorder %s755_s6, %s874_s0 }
  0x19   : > { %p551_p6 = pnand %p550_p5, %p549_p3  ;;  %p555_p10 = scmp.lt.u32.totalorder %s553_s21, %s548_s11 }
  0x1a   : > { %p557_p12 = scmp.lt.u32.totalorder %s548_s11, %s755_s6 }
  0x1b   : > { %p552_p7 = pneg %p551_p6  ;;  %p556_p13 = por %p555_p10, %p554_p4 }
  0x1d   : > { %p558_p1 = por %p557_p12, %p556_p13 }
  0x1f   : > { %p559_p2 = pnand %p558_p1, %p552_p7 }
  0x21   : > { %562 = shalt.err (!%p559_p2)
}
  0x22   : > { %s563_s28 = scalar_lea.vmem %s757_s8, 128  ;;  %s662_s29 = smov [#allocation2]  }
  0x23   : > { %p564_p3 = scmp.ne.s32.totalorder %s757_s8, %s563_s28  ;;  %s568_s30 = sshll.u32 %s662_s29, 4  ;;  %s569_s30 = int_to_ptr.vmem [resolvable:$false] %s568_s30 }
  0x24   : > { %s570_s4 = scalar_lea.vmem %s569_s30, 256  ;;  %p571_p9 = scmp.lt.s32.totalorder %s757_s8, %s569_s30 }
  0x25   : > { %p566_p6 = pnand %p564_p3, %p550_p5  ;;  %p572_p4 = scmp.lt.s32.totalorder %s570_s4, %s563_s28 }
  0x27   : > { %p567_p11 = pneg %p566_p6  ;;  %p573_p10 = por %p572_p4, %p571_p9 }
  0x29   : > { %p574_p12 = pnand %p573_p10, %p567_p11 }
  0x2b   : > { %577 = shalt.err (!%p574_p12)
}
  0x2c   : > { %485 = dma.hbm_to_vmem [thread:$0]  (!%p761_p0), %s755_s6, 128, %s757_s8, %s154_s10  }
  0x2d   : > { %p884_p1 = scmp.lt.s32.totalorder %s660_s17, 3  ;;  %p885_p2 = scmp.ge.s32.totalorder %s660_s17, 1 }
  0x2f   : > { %p173_p5 = pnand %p885_p2, %p884_p1 }
  0x30   : > { %s797_s5 = sand.u32 (!%p173_p5), 1, %s644_s13  }
  0x31   : > { %176 = sbr.rel (%p173_p5) target bundleno = 318 (0x13e), region = 32  ;;  %s466_s7 = sshll.u32 (!%p173_p5), %s797_s5, 3 }
  0x32   : > { %s179_s11 = scalar_lea.sflag (!%p173_p5), [#allocation3], %s797_s5  ;;  %s182_s9 = scalar_lea.vmem (!%p173_p5), [#allocation2], %s466_s7 }
  0x38   : > { %631 = dma.done.wait (%p733_p8), %s179_s11, 128  }
  0x39   : > { %633 = vsyncadd (%p733_p8), %s179_s11, 4294967168  ;;  %v663_v0 = vmov 0.0   ;;  %v664_v1 = vmov 0   ;;  %vm213_vm0 = vcmask 1043456   ;;  %v209_v2 = vld [vmem:[%s182_s9] sm:$0xff]  ;;  %vm262_vm1 = vcmask 31744  }
  0x3a   : > { %334 = vmatprep.mubr.f32.mxu0 %v663_v0  ;;  %542 = vset.pattern.permute.xlu0 %v664_v1  ;;  %v208_v3 = vld [vmem:[%s876_s2] sm:$0xf]  ;;  %v211_v4 = vcombine.high %v209_v2, %v209_v2  ;;  %v214_v5 = vsel %vm213_vm0, %v209_v2, 0.0  ;;  %s477_s18 = sshll.u32 %s652_s15, 7  ;;  %s204_s19 = scalar_lea.vmem [#allocation5], %s466_s7 }
  0x3b   : > { %345 = vperm.xlu0 %542, %v208_v3   ;;  %v215_v6 = vrot.slane %v214_v5, 4  ;;  %v207_v25 = vld [vmem:[%s875_s1] sm:$0xf]  ;;  %s374_s21 = sshll.u32 %s204_s19, 4  ;;  %s825_s28 = scalar_lea.hbm %s877_s3, %s477_s18  ;;  %s827_s21 = int_to_ptr.vmem [resolvable:$true] %s374_s21 }
  0x3c   : > { %v221_v7 = vsel %vm213_vm0, %v211_v4, 0.0  ;;  %s358_s29 = scalar_lea.sflag [#allocation4], %s797_s5  ;;  %s578_s30 = scalar_lea.vmem %s827_s21, 128 }
  0x3d   : > { %v216_v8 = vadd.f32 %v215_v6, %v214_v5  ;;  %v222_v9 = vrot.slane %v221_v7, 4  ;;  %p579_p8 = scmp.ne.s32.totalorder %s827_s21, %s578_s30  ;;  %p886_p9 = scmp.ne.s32.totalorder %s881_s25, 0 }
  0x3e   : > { %s665_s15 = smov [#allocation5]  }
  0x3f   : > { %v217_v10 = vrot.slane %v216_v8, 2  ;;  %v223_v11 = vadd.f32 %v222_v9, %v221_v7  ;;  %p580_p11 = pnand %p579_p8, %p886_p9  ;;  %s582_s4 = sshll.u32 %s665_s15, 4  ;;  %s583_s4 = int_to_ptr.vmem [resolvable:$false] %s582_s4 }
  0x40   : > { %s584_s7 = scalar_lea.vmem %s583_s4, 256  ;;  %p585_p7 = scmp.lt.s32.totalorder %s827_s21, %s583_s4 }
  0x41   : > { %v218_v12 = vadd.f32 %v217_v10, %v216_v8  ;;  %v224_v13 = vrot.slane %v223_v11, 2  ;;  %p581_p0 = pneg %p580_p11  ;;  %p586_p13 = scmp.lt.s32.totalorder %s584_s7, %s578_s30 }
  0x43   : > { %v219_v14 = vrot.slane %v218_v12, 1  ;;  %v225_v15 = vadd.f32 %v224_v13, %v223_v11  ;;  %p587_p3 = por %p586_p13, %p585_p7 }
  0x45   : > { %v220_v16 = vadd.f32 %v219_v14, %v218_v12  ;;  %v226_v17 = vrot.slane %v225_v15, 1  ;;  %p588_p6 = pnand %p587_p3, %p581_p0 }
  0x47   : > { %v227_v18 = vadd.f32 %v226_v17, %v225_v15  ;;  %v229_v19 = vmul.f32 0.25, %v220_v16 }
  0x49   : > { %v230_v20 = vmul.f32 0.25, %v227_v18 }
  0x4b   : > { %v233_v21 = vcombine.low %v229_v19, %v230_v20 }
  0x4d   : > { %v235_v22 = vsub.f32 %v209_v2, %v233_v21 }
  0x4f   : > { %v236_v23 = vmul.f32 %v235_v22, %v235_v22  ;;  %v261_v24 = vcombine.high %v235_v22, %v235_v22 }
  0x51   : > { %v238_v26 = vcombine.high %v236_v23, %v236_v23  ;;  %v240_v27 = vsel %vm213_vm0, %v236_v23, 0.0  ;;  %468 = vmatprep.subr.msk.mxu0 %vm213_vm0, %v261_v24 }
  0x52   : > { %469 = vmatpush1.msk.msra.mxu0 %vm213_vm0, %v235_v22  ;;  %v241_v29 = vrot.slane %v240_v27, 4 }
  0x53   : > { %v247_v28 = vsel %vm213_vm0, %v238_v26, 0.0  ;;  %470 = vmatmul.mubr.msk.f32.vlgmr.msra.gmra.mrb[0].mxu0 %vm262_vm1, %v207_v25 }
  0x54   : > { %v248_v30 = vrot.slane %v247_v28, 4  ;;  %v242_v31 = vadd.f32 %v241_v29, %v240_v27 }
  0x56   : > { %v249_v32 = vadd.f32 %v248_v30, %v247_v28  ;;  %v243_v33 = vrot.slane %v242_v31, 2 }
  0x58   : > { %v250_v34 = vrot.slane %v249_v32, 2  ;;  %v244_v35 = vadd.f32 %v243_v33, %v242_v31 }
  0x5a   : > { %v251_v36 = vadd.f32 %v250_v34, %v249_v32  ;;  %v245_v37 = vrot.slane %v244_v35, 1 }
  0x5c   : > { %v252_v38 = vrot.slane %v251_v36, 1  ;;  %v246_v39 = vadd.f32 %v245_v37, %v244_v35 }
  0x5e   : > { %v253_v40 = vadd.f32 %v252_v38, %v251_v36  ;;  %v254_v41 = vmul.f32 0.25, %v246_v39 }
  0x60   : > { %v255_v42 = vmul.f32 0.25, %v253_v40  ;;  %v256_v43 = vadd.f32 1e-05, %v254_v41 }
  0x62   : > { %v257_v44 = vadd.f32 1e-05, %v255_v42  ;;  %544 = vrsqrt.f32 %v256_v43 }
  0x64   : > { %546 = vrsqrt.f32 %v257_v44 }
  0x6c   : > { %v545_v45 = vpop.eup %544 }
  0x6e   : > { %v547_v46 = vpop.eup %546 }
  0xba   : > { %v346_v48 = vpop.permute.xlu0 %345 }
 0x126   : > { %v336_v47 = vpop.f32.mrb[0].mxu0 }
 0x127   : > { %v341_v49 = vmul.f32 %v545_v45, %v336_v47  ;;  %v338_v50 = vpop.f32.mrb[1].mxu0 }
 0x128   : > { %v342_v51 = vmul.f32 %v547_v46, %v338_v50 }
 0x129   : > { %v348_v52 = vadd.f32 %v346_v48, %v341_v49 }
 0x12a   : > { %v349_v53 = vadd.f32 %v346_v48, %v342_v51 }
 0x12b   : > { %v350_v54 = vadd.f32 %v348_v52, %v209_v2 }
 0x12c   : > { %v351_v55 = vadd.f32 %v349_v53, %v211_v4 }
 0x12e   : > { %v354_v56 = vcombine.low %v350_v54, %v351_v55 }
 0x130   : > { %356 = vst [vmem:[%s204_s19] sm:$0xff] %v354_v56 }
 0x131   : > { %591 = shalt.err (!%p588_p6)
}
 0x132   : > { %s592_s5 = scalar_lea.hbm %s825_s28, 128  ;;  %s596_s6 = scalar_lea.hbm %s877_s3, 256 }
 0x133   : > { %p593_p4 = scmp.ne.s32.totalorder %s825_s28, %s592_s5  ;;  %p597_p1 = scmp.lt.u32.totalorder %s825_s28, %s877_s3 }
 0x134   : > { %p598_p2 = scmp.lt.u32.totalorder %s596_s6, %s592_s5  ;;  %p600_p8 = scmp.lt.u32.totalorder %s592_s5, %s825_s28 }
 0x135   : > { %p594_p10 = pnand %p593_p4, %p886_p9 }
 0x136   : > { %p599_p5 = por %p598_p2, %p597_p1 }
 0x137   : > { %p595_p12 = pneg %p594_p10 }
 0x138   : > { %p601_p11 = por %p600_p8, %p599_p5 }
 0x13a   : > { %p602_p0 = pnand %p601_p11, %p595_p12 }
 0x13c   : > { %605 = shalt.err (!%p602_p0)
}
 0x13d   : > { %480 = dma.vmem_to_hbm [thread:$0]  (%p886_p9), %s827_s21, 128, %s825_s28, %s358_s29  }
 0x13e PF: > { %s386_s10 = sand.u32 1, %s640_s12   ;;  %p887_p7 = scmp.ne.s32.totalorder %s882_s27, 0 }
 0x13f   : > { %p888_p13 = scmp.ge.s32.totalorder %s660_s17, 2  ;;  %s387_s18 = scalar_lea.sflag [#allocation4], %s386_s10 }
 0x141   : > { %p487_p3 = pnand %p888_p13, %p887_p7 }
 0x143   : > { %635 = dma.done.wait (!%p487_p3), %s387_s18, 128  }
 0x144   : > { %637 = vsyncadd (!%p487_p3), %s387_s18, 4294967168  ;;  %s19_s17 = sadd.s32 1, %s660_s17   ;;  %s889_s12 = smov %s644_s13 }
 0x145   : > { %p16_p6 = scmp.ge.s32.totalorder %s19_s17, 4   ;;  %s890_s13 = smov %s648_s14 }
 0x146   : > { %s891_s14 = smov %s742_s26  ;;  %s892_s15 = smov %s656_s16 }
 0x147   : > { %s893_s16 = smov %s895_s20  ;;  %18 = sbr.rel (!%p16_p6) target bundleno = 6 (0x6), region = 77 }
 0x14e   :  { %392 = vsyncpa [#allocation3], 1 }
 0x14f   :  { %394 = vsyncpa [#allocation3 + $0x1], 1 }
 0x150   :  { %395 = vsyncpa [#allocation4], 1 }
 0x151   :  { %397 = vsyncpa [#allocation4 + $0x1], 1 }

// kernel: tpu_custom_call.1
= control target key start
LH: loop header
LB: loop body
LE: loop exit
PB: predicated region body
PF: predicated region fallthrough
CT: control target
= control target key end

     0   :  { %8 = vsyncpa [#allocation3], 0  ;;  %s874_s0 = inlined_call_operand.hbm [shape: f32[2,4,256], index: 0, kind: input, shape index: {}]   ;;  %s875_s1 = inlined_call_operand.vmem [shape: f32[4,4], index: 1, kind: input, shape index: {}]   ;;  %s876_s2 = inlined_call_operand.vmem [shape: f32[4,1], index: 2, kind: input, shape index: {}]   ;;  %s877_s3 = inlined_call_operand.hbm [shape: f32[2,4,256], index: 3, kind: output, shape index: {}]  }
   0x1   :  { %10 = vsyncpa [#allocation3 + $0x1], 0 }
   0x2   :  { %11 = vsyncpa [#allocation4], 0 }
   0x3   :  { %13 = vsyncpa [#allocation4 + $0x1], 0  ;;  %s686_s12 = smov 0   ;;  %s688_s13 = smov 0  }
   0x4   :  { %s690_s14 = smov 0   ;;  %s692_s15 = smov 0  }
   0x5   :  { %s694_s16 = smov 0   ;;  %s696_s17 = smov 0  }
   0x6 LB: > { %s458_s18 = sadd.s32 4294967295, %s660_s17   ;;  %s459_s19 = sadd.s32 4294967294, %s660_s17   ;;  %s660_s17 = sphi %s696_s17, %s19_s17   ;;  %s656_s16 = sphi %s694_s16, %s893_s16   ;;  %s652_s15 = sphi %s692_s15, %s892_s15   ;;  %s648_s14 = sphi %s690_s14, %s891_s14   ;;  %s644_s13 = sphi %s688_s13, %s890_s13   ;;  %s640_s12 = sphi %s686_s12, %s889_s12  }
   0x7   : > { %s31_s20 = sadd.s32 1, %s656_s16  ;;  %s40_s21 = sadd.s32 1, %s648_s14 }
   0x8   : > { %p33_p0 = scmp.ge.s32.totalorder %s31_s20, 2  ;;  %p47_p1 = scmp.ne.s32.totalorder %s648_s14, %s644_s13 }
   0x9   : > { %p48_p2 = scmp.eq.s32.totalorder %s660_s17, 0  ;;  %p53_p3 = scmp.ne.s32.totalorder %s644_s13, %s640_s12 }
   0xa   : > { %s895_s20 = smov (%p33_p0, %s31_s20), 0  ;;  %p54_p5 = scmp.eq.s32.totalorder %s458_s18, 0 }
   0xb   : > { %p727_p4 = por %p48_p2, %p47_p1  ;;  %s35_s23 = ssub.s32 %s656_s16, %s895_s20 }
   0xc   : > { %p121_p6 = scmp.eq.s32.totalorder %s458_s18, 1  ;;  %p38_p7 = scmp.eq.s32.totalorder %s35_s23, 0 }
   0xd   : > { %p733_p8 = por %p54_p5, %p53_p3  ;;  %p127_p10 = scmp.eq.s32.totalorder %s459_s19, 1 }
   0xe   : > { %p737_p9 = por %p121_p6, %p47_p1  ;;  %p490_p13 = scmp.lt.s32.totalorder %s660_s17, 2 }
   0xf   : > { %s742_s26 = scalar_select %p38_p7, %s648_s14, %s40_s21  }
  0x10   : > { %s881_s25 = scalar_select %p737_p9, 1, 0 }
  0x11   : > { %p744_p11 = por %p127_p10, %p53_p3  ;;  %s153_s28 = sand.u32 1, %s648_s14  }
  0x12   : > { %s462_s29 = sshll.u32 %s153_s28, 3  ;;  %s476_s30 = sshll.u32 %s656_s16, 7 }
  0x13   : > { %s882_s27 = scalar_select %p744_p11, 1, 0 }
  0x14   : > { %s755_s6 = scalar_lea.hbm %s874_s0, %s476_s30  ;;  %s157_s7 = scalar_lea.vmem [#allocation2], %s462_s29 }
  0x15   : > { %s167_s8 = sshll.u32 %s157_s7, 4  ;;  %p761_p0 = pnand %p490_p13, %p727_p4  ;;  %s757_s8 = int_to_ptr.vmem [resolvable:$true] %s167_s8 }
  0x16   : > { %s154_s10 = scalar_lea.sflag [#allocation3], %s153_s28  ;;  %s548_s11 = scalar_lea.hbm %s755_s6, 128 }
  0x17   : > { %p549_p3 = scmp.ne.s32.totalorder %s755_s6, %s548_s11  ;;  %p550_p5 = pneg %p761_p0 }
  0x18   : > { %s553_s21 = scalar_lea.hbm %s874_s0, 256  ;;  %p554_p4 = scmp.lt.u32.totalorder %s755_s6, %s874_s0 }
  0x19   : > { %p551_p6 = pnand %p550_p5, %p549_p3  ;;  %p555_p10 = scmp.lt.u32.totalorder %s553_s21, %s548_s11 }
  0x1a   : > { %p557_p12 = scmp.lt.u32.totalorder %s548_s11, %s755_s6 }
  0x1b   : > { %p552_p7 = pneg %p551_p6  ;;  %p556_p13 = por %p555_p10, %p554_p4 }
  0x1d   : > { %p558_p1 = por %p557_p12, %p556_p13 }
  0x1f   : > { %p559_p2 = pnand %p558_p1, %p552_p7 }
  0x21   : > { %562 = shalt.err (!%p559_p2)
}
  0x22   : > { %s563_s28 = scalar_lea.vmem %s757_s8, 128  ;;  %s662_s29 = smov [#allocation2]  }
  0x23   : > { %p564_p3 = scmp.ne.s32.totalorder %s757_s8, %s563_s28  ;;  %s568_s30 = sshll.u32 %s662_s29, 4  ;;  %s569_s30 = int_to_ptr.vmem [resolvable:$false] %s568_s30 }
  0x24   : > { %s570_s4 = scalar_lea.vmem %s569_s30, 256  ;;  %p571_p9 = scmp.lt.s32.totalorder %s757_s8, %s569_s30 }
  0x25   : > { %p566_p6 = pnand %p564_p3, %p550_p5  ;;  %p572_p4 = scmp.lt.s32.totalorder %s570_s4, %s563_s28 }
  0x27   : > { %p567_p11 = pneg %p566_p6  ;;  %p573_p10 = por %p572_p4, %p571_p9 }
  0x29   : > { %p574_p12 = pnand %p573_p10, %p567_p11 }
  0x2b   : > { %577 = shalt.err (!%p574_p12)
}
  0x2c   : > { %485 = dma.hbm_to_vmem [thread:$0]  (!%p761_p0), %s755_s6, 128, %s757_s8, %s154_s10  }
  0x2d   : > { %p884_p1 = scmp.lt.s32.totalorder %s660_s17, 3  ;;  %p885_p2 = scmp.ge.s32.totalorder %s660_s17, 1 }
  0x2f   : > { %p173_p5 = pnand %p885_p2, %p884_p1 }
  0x30   : > { %s797_s5 = sand.u32 (!%p173_p5), 1, %s644_s13  }
  0x31   : > { %176 = sbr.rel (%p173_p5) target bundleno = 318 (0x13e), region = 32  ;;  %s466_s7 = sshll.u32 (!%p173_p5), %s797_s5, 3 }
  0x32   : > { %s179_s11 = scalar_lea.sflag (!%p173_p5), [#allocation3], %s797_s5  ;;  %s182_s9 = scalar_lea.vmem (!%p173_p5), [#allocation2], %s466_s7 }
  0x38   : > { %631 = dma.done.wait (%p733_p8), %s179_s11, 128  }
  0x39   : > { %633 = vsyncadd (%p733_p8), %s179_s11, 4294967168  ;;  %v663_v0 = vmov 0.0   ;;  %v664_v1 = vmov 0   ;;  %vm213_vm0 = vcmask 1043456   ;;  %v209_v2 = vld [vmem:[%s182_s9] sm:$0xff]  ;;  %vm262_vm1 = vcmask 31744  }
  0x3a   : > { %334 = vmatprep.mubr.f32.mxu0 %v663_v0  ;;  %542 = vset.pattern.permute.xlu0 %v664_v1  ;;  %v208_v3 = vld [vmem:[%s876_s2] sm:$0xf]  ;;  %v211_v4 = vcombine.high %v209_v2, %v209_v2  ;;  %v214_v5 = vsel %vm213_vm0, %v209_v2, 0.0  ;;  %s477_s18 = sshll.u32 %s652_s15, 7  ;;  %s204_s19 = scalar_lea.vmem [#allocation5], %s466_s7 }
  0x3b   : > { %345 = vperm.xlu0 %542, %v208_v3   ;;  %v215_v6 = vrot.slane %v214_v5, 4  ;;  %v207_v25 = vld [vmem:[%s875_s1] sm:$0xf]  ;;  %s374_s21 = sshll.u32 %s204_s19, 4  ;;  %s825_s28 = scalar_lea.hbm %s877_s3, %s477_s18  ;;  %s827_s21 = int_to_ptr.vmem [resolvable:$true] %s374_s21 }
  0x3c   : > { %v221_v7 = vsel %vm213_vm0, %v211_v4, 0.0  ;;  %s358_s29 = scalar_lea.sflag [#allocation4], %s797_s5  ;;  %s578_s30 = scalar_lea.vmem %s827_s21, 128 }
  0x3d   : > { %v216_v8 = vadd.f32 %v215_v6, %v214_v5  ;;  %v222_v9 = vrot.slane %v221_v7, 4  ;;  %p579_p8 = scmp.ne.s32.totalorder %s827_s21, %s578_s30  ;;  %p886_p9 = scmp.ne.s32.totalorder %s881_s25, 0 }
  0x3e   : > { %s665_s15 = smov [#allocation5]  }
  0x3f   : > { %v217_v10 = vrot.slane %v216_v8, 2  ;;  %v223_v11 = vadd.f32 %v222_v9, %v221_v7  ;;  %p580_p11 = pnand %p579_p8, %p886_p9  ;;  %s582_s4 = sshll.u32 %s665_s15, 4  ;;  %s583_s4 = int_to_ptr.vmem [resolvable:$false] %s582_s4 }
  0x40   : > { %s584_s7 = scalar_lea.vmem %s583_s4, 256  ;;  %p585_p7 = scmp.lt.s32.totalorder %s827_s21, %s583_s4 }
  0x41   : > { %v218_v12 = vadd.f32 %v217_v10, %v216_v8  ;;  %v224_v13 = vrot.slane %v223_v11, 2  ;;  %p581_p0 = pneg %p580_p11  ;;  %p586_p13 = scmp.lt.s32.totalorder %s584_s7, %s578_s30 }
  0x43   : > { %v219_v14 = vrot.slane %v218_v12, 1  ;;  %v225_v15 = vadd.f32 %v224_v13, %v223_v11  ;;  %p587_p3 = por %p586_p13, %p585_p7 }
  0x45   : > { %v220_v16 = vadd.f32 %v219_v14, %v218_v12  ;;  %v226_v17 = vrot.slane %v225_v15, 1  ;;  %p588_p6 = pnand %p587_p3, %p581_p0 }
  0x47   : > { %v227_v18 = vadd.f32 %v226_v17, %v225_v15  ;;  %v229_v19 = vmul.f32 0.25, %v220_v16 }
  0x49   : > { %v230_v20 = vmul.f32 0.25, %v227_v18 }
  0x4b   : > { %v233_v21 = vcombine.low %v229_v19, %v230_v20 }
  0x4d   : > { %v235_v22 = vsub.f32 %v209_v2, %v233_v21 }
  0x4f   : > { %v236_v23 = vmul.f32 %v235_v22, %v235_v22  ;;  %v261_v24 = vcombine.high %v235_v22, %v235_v22 }
  0x51   : > { %v238_v26 = vcombine.high %v236_v23, %v236_v23  ;;  %v240_v27 = vsel %vm213_vm0, %v236_v23, 0.0  ;;  %468 = vmatprep.subr.msk.mxu0 %vm213_vm0, %v261_v24 }
  0x52   : > { %469 = vmatpush1.msk.msra.mxu0 %vm213_vm0, %v235_v22  ;;  %v241_v29 = vrot.slane %v240_v27, 4 }
  0x53   : > { %v247_v28 = vsel %vm213_vm0, %v238_v26, 0.0  ;;  %470 = vmatmul.mubr.msk.f32.vlgmr.msra.gmra.mrb[0].mxu0 %vm262_vm1, %v207_v25 }
  0x54   : > { %v248_v30 = vrot.slane %v247_v28, 4  ;;  %v242_v31 = vadd.f32 %v241_v29, %v240_v27 }
  0x56   : > { %v249_v32 = vadd.f32 %v248_v30, %v247_v28  ;;  %v243_v33 = vrot.slane %v242_v31, 2 }
  0x58   : > { %v250_v34 = vrot.slane %v249_v32, 2  ;;  %v244_v35 = vadd.f32 %v243_v33, %v242_v31 }
  0x5a   : > { %v251_v36 = vadd.f32 %v250_v34, %v249_v32  ;;  %v245_v37 = vrot.slane %v244_v35, 1 }
  0x5c   : > { %v252_v38 = vrot.slane %v251_v36, 1  ;;  %v246_v39 = vadd.f32 %v245_v37, %v244_v35 }
  0x5e   : > { %v253_v40 = vadd.f32 %v252_v38, %v251_v36  ;;  %v254_v41 = vmul.f32 0.25, %v246_v39 }
  0x60   : > { %v255_v42 = vmul.f32 0.25, %v253_v40  ;;  %v256_v43 = vadd.f32 1e-05, %v254_v41 }
  0x62   : > { %v257_v44 = vadd.f32 1e-05, %v255_v42  ;;  %544 = vrsqrt.f32 %v256_v43 }
  0x64   : > { %546 = vrsqrt.f32 %v257_v44 }
  0x6c   : > { %v545_v45 = vpop.eup %544 }
  0x6e   : > { %v547_v46 = vpop.eup %546 }
  0xba   : > { %v346_v48 = vpop.permute.xlu0 %345 }
 0x126   : > { %v336_v47 = vpop.f32.mrb[0].mxu0 }
 0x127   : > { %v341_v49 = vmul.f32 %v545_v45, %v336_v47  ;;  %v338_v50 = vpop.f32.mrb[1].mxu0 }
 0x128   : > { %v342_v51 = vmul.f32 %v547_v46, %v338_v50 }
 0x129   : > { %v348_v52 = vadd.f32 %v346_v48, %v341_v49 }
 0x12a   : > { %v349_v53 = vadd.f32 %v346_v48, %v342_v51 }
 0x12b   : > { %v350_v54 = vadd.f32 %v348_v52, %v209_v2 }
 0x12c   : > { %v351_v55 = vadd.f32 %v349_v53, %v211_v4 }
 0x12e   : > { %v354_v56 = vcombine.low %v350_v54, %v351_v55 }
 0x130   : > { %356 = vst [vmem:[%s204_s19] sm:$0xff] %v354_v56 }
 0x131   : > { %591 = shalt.err (!%p588_p6)
}
 0x132   : > { %s592_s5 = scalar_lea.hbm %s825_s28, 128  ;;  %s596_s6 = scalar_lea.hbm %s877_s3, 256 }
 0x133   : > { %p593_p4 = scmp.ne.s32.totalorder %s825_s28, %s592_s5  ;;  %p597_p1 = scmp.lt.u32.totalorder %s825_s28, %s877_s3 }
 0x134   : > { %p598_p2 = scmp.lt.u32.totalorder %s596_s6, %s592_s5  ;;  %p600_p8 = scmp.lt.u32.totalorder %s592_s5, %s825_s28 }
 0x135   : > { %p594_p10 = pnand %p593_p4, %p886_p9 }
 0x136   : > { %p599_p5 = por %p598_p2, %p597_p1 }
 0x137   : > { %p595_p12 = pneg %p594_p10 }
 0x138   : > { %p601_p11 = por %p600_p8, %p599_p5 }
 0x13a   : > { %p602_p0 = pnand %p601_p11, %p595_p12 }
 0x13c   : > { %605 = shalt.err (!%p602_p0)
}
 0x13d   : > { %480 = dma.vmem_to_hbm [thread:$0]  (%p886_p9), %s827_s21, 128, %s825_s28, %s358_s29  }
 0x13e PF: > { %s386_s10 = sand.u32 1, %s640_s12   ;;  %p887_p7 = scmp.ne.s32.totalorder %s882_s27, 0 }
 0x13f   : > { %p888_p13 = scmp.ge.s32.totalorder %s660_s17, 2  ;;  %s387_s18 = scalar_lea.sflag [#allocation4], %s386_s10 }
 0x141   : > { %p487_p3 = pnand %p888_p13, %p887_p7 }
 0x143   : > { %635 = dma.done.wait (!%p487_p3), %s387_s18, 128  }
 0x144   : > { %637 = vsyncadd (!%p487_p3), %s387_s18, 4294967168  ;;  %s19_s17 = sadd.s32 1, %s660_s17   ;;  %s889_s12 = smov %s644_s13 }
 0x145   : > { %p16_p6 = scmp.ge.s32.totalorder %s19_s17, 4   ;;  %s890_s13 = smov %s648_s14 }
 0x146   : > { %s891_s14 = smov %s742_s26  ;;  %s892_s15 = smov %s656_s16 }
 0x147   : > { %s893_s16 = smov %s895_s20  ;;  %18 = sbr.rel (!%p16_p6) target bundleno = 6 (0x6), region = 77 }
 0x14e   :  { %392 = vsyncpa [#allocation3], 1 }
 0x14f   :  { %394 = vsyncpa [#allocation3 + $0x1], 1 }
 0x150   :  { %395 = vsyncpa [#allocation4], 1 }
 0x151   :  { %397 = vsyncpa [#allocation4 + $0x1], 1 }

</bundles_post_ra>
